<compile_context>
chip_gen: v6e
topology: v6e:2x2x1
jax: 0.10.0
libtpu: 0.0.40
codegen_flags: <defaults>
</compile_context>

<pallas_src>
import jax
import jax.numpy as jnp
from jax.experimental import pallas as pl
from jax.experimental.pallas import tpu as pltpu

H_NUM = 90      # self.hnum in the PyTorch module
H_PAD = 128     # padded hidden width (lane-aligned)
N_CLS = 4       # fc1 output dim


def _rnn_kernel(len_ref, pre1_ref,
                whh1_ref,
                wih2_ref, b2_ref, whh2_ref,
                wfc_ref, bfc_ref,
                out_ref):
    """Recurrent hot path.

    len_ref  : (B, 1)    int32  per-row valid length
    pre1_ref : (T*B, Hp) f32    time-major, pre-projected layer-0 inputs (x@W_ih_l0 + b1)
    whh1_ref : (Hp, Hp)  bf16   layer-0 recurrent weights (pre-transposed, zero-padded)
    wih2_ref : (Hp, Hp)  bf16   layer-1 input weights
    b2_ref   : (1, Hp)   f32    layer-1 combined bias (b_ih + b_hh)
    whh2_ref : (Hp, Hp)  bf16   layer-1 recurrent weights
    wfc_ref  : (Hp, 4)   bf16   fc1 weights (pre-transposed, zero-padded rows)
    bfc_ref  : (1, 4)    f32
    out_ref  : (B, 4)    f32    softmax probabilities
    """
    B = len_ref.shape[0]
    TB = pre1_ref.shape[0]
    T = TB // B
    Hp = whh1_ref.shape[0]

    lens = len_ref[...]                                   # (B, 1) int32

    # ---------------- layer 0 recurrence ----------------
    # Input projection was precomputed (folded into the embedding table); only the
    # recurrent K=128 dot is on the per-step critical path.
    whh1 = whh1_ref[...]                                  # (Hp, Hp) bf16
    h1 = jnp.zeros((B, Hp), jnp.float32)
    h1_steps = []
    for t in range(T):                                    # static unroll (T small & static)
        mask = lens > t                                   # packed-sequence mask
        h1_new = jnp.tanh(
            pre1_ref[t * B:(t + 1) * B, :]
            + jnp.dot(h1.astype(jnp.bfloat16), whh1,
                      preferred_element_type=jnp.float32))
        h1 = jnp.where(mask, h1_new, h1)
        h1_steps.append(h1)                               # keep f32; one cast below

    # Layer-1 input projection hoisted out of the recurrence: ONE (T*B,Hp)x(Hp,Hp) dot.
    h1_all = jnp.concatenate(h1_steps, axis=0).astype(jnp.bfloat16)   # (T*B, Hp)
    pre2 = jnp.dot(h1_all, wih2_ref[...],
                   preferred_element_type=jnp.float32) + b2_ref[...]  # (T*B, Hp) f32

    # ---------------- layer 1 recurrence ----------------
    whh2 = whh2_ref[...]                                  # (Hp, Hp) bf16
    h2 = jnp.zeros((B, Hp), jnp.float32)
    for t in range(T):
        mask = lens > t
        h2_new = jnp.tanh(
            pre2[t * B:(t + 1) * B, :]
            + jnp.dot(h2.astype(jnp.bfloat16), whh2,
                      preferred_element_type=jnp.float32))
        h2 = jnp.where(mask, h2_new, h2)

    # ---------------- fc1 + softmax ----------------
    logits = jnp.dot(h2.astype(jnp.bfloat16), wfc_ref[...],
                     preferred_element_type=jnp.float32) + bfc_ref[...]   # (B, 4)
    m = jnp.max(logits, axis=1, keepdims=True)
    e = jnp.exp(logits - m)
    out_ref[...] = e / jnp.sum(e, axis=1, keepdims=True)


def _pad2d(w, rows, cols, dtype=jnp.float32):
    out = jnp.zeros((rows, cols), jnp.float32)
    out = out.at[: w.shape[0], : w.shape[1]].set(w.astype(jnp.float32))
    return out.astype(dtype)


def prepare_params(params):
    """One-time weight preprocessing (do NOT run per forward call)."""
    emb = params["embedding"].astype(jnp.float32)          # (V, E)
    V, E = emb.shape

    # Fold embedding + W_ih_l0 + combined layer-0 bias into one (V, H_PAD) table.
    b1 = jnp.zeros((H_PAD,), jnp.float32).at[:H_NUM].set(
        (params["b_ih_l0"] + params["b_hh_l0"]).astype(jnp.float32))
    wih1 = _pad2d(params["w_ih_l0"].T, E, H_PAD)           # (E, Hp) f32
    pre_table = emb @ wih1 + b1[None, :]                   # (V, Hp) f32

    b2 = jnp.zeros((1, H_PAD), jnp.float32).at[0, :H_NUM].set(
        (params["b_ih_l1"] + params["b_hh_l1"]).astype(jnp.float32))

    return {
        "pre_table": pre_table,                                        # (V, Hp) f32
        "whh1": _pad2d(params["w_hh_l0"].T, H_PAD, H_PAD, jnp.bfloat16),
        "wih2": _pad2d(params["w_ih_l1"].T, H_PAD, H_PAD, jnp.bfloat16),
        "b2": b2,
        "whh2": _pad2d(params["w_hh_l1"].T, H_PAD, H_PAD, jnp.bfloat16),
        "wfc": _pad2d(params["fc_w"].T, H_PAD, N_CLS, jnp.bfloat16),
        "bfc": params["fc_b"].reshape(1, N_CLS).astype(jnp.float32),
    }


def recurrent_network_forward(tokens, prep):
    """Equivalent of RecurrentNetwork.forward(x). tokens: (B, T) int32, 0 = padding."""
    B, T = tokens.shape

    # computelengths(): index of first 0 in each row, else T.
    # TODO(synk): rows of length 0 (leading pad) would raise in PyTorch's
    # pack_padded_sequence; here they simply keep a zero hidden state.
    is_zero = (tokens == 0)
    first_zero = jnp.argmax(is_zero, axis=1)
    lengths = jnp.where(is_zero.any(axis=1), first_zero, T).astype(jnp.int32)

    # Embedding lookup + layer-0 input projection are a single gather from pre_table.
    pre1 = prep["pre_table"][tokens]                       # (B, T, Hp) f32
    pre1 = jnp.transpose(pre1, (1, 0, 2)).reshape(T * B, H_PAD)   # time-major (T*B, Hp)

    vmem = pl.BlockSpec(memory_space=pltpu.MemorySpace.VMEM)
    out = pl.pallas_call(
        _rnn_kernel,
        out_shape=jax.ShapeDtypeStruct((B, N_CLS), jnp.float32),
        in_specs=[vmem] * 8,
        out_specs=vmem,
    )(
        lengths.reshape(B, 1), pre1,
        prep["whh1"],
        prep["wih2"], prep["b2"], prep["whh2"],
        prep["wfc"], prep["bfc"],
    )
    return out


def make_params(key, vocab, emb_dim):
    """Deterministic parameter init mirroring nn.RNN / nn.Linear shapes."""
    ks = jax.random.split(key, 12)
    k_rnn = 1.0 / jnp.sqrt(jnp.float32(H_NUM))
    u = lambda k, shape: jax.random.uniform(k, shape, jnp.float32, -k_rnn, k_rnn)
    return {
        "embedding": jax.random.normal(ks[0], (vocab, emb_dim), jnp.float32),
        "w_ih_l0": u(ks[1], (H_NUM, emb_dim)),
        "w_hh_l0": u(ks[2], (H_NUM, H_NUM)),
        "b_ih_l0": u(ks[3], (H_NUM,)),
        "b_hh_l0": u(ks[4], (H_NUM,)),
        "w_ih_l1": u(ks[5], (H_NUM, H_NUM)),
        "w_hh_l1": u(ks[6], (H_NUM, H_NUM)),
        "b_ih_l1": u(ks[7], (H_NUM,)),
        "b_hh_l1": u(ks[8], (H_NUM,)),
        "fc_w": u(ks[9], (N_CLS, H_NUM)),
        "fc_b": u(ks[10], (N_CLS,)),
    }


if __name__ == "__main__":
    key = jax.random.PRNGKey(0)
    k_params, k_tok = jax.random.split(key)

    VOCAB, EMB_DIM, B, T = 50, 32, 8, 8
    params = make_params(k_params, VOCAB, EMB_DIM)

    # One-time weight preprocessing (cached outside the per-call path).
    prep = prepare_params(params)
    jax.block_until_ready(prep)

    # Token ids in [1, VOCAB), with trailing 0-padding of varying lengths.
    tokens = jax.random.randint(k_tok, (B, T), 1, VOCAB, dtype=jnp.int32)
    tokens = tokens.at[0, 5:].set(0)   # length 5
    tokens = tokens.at[1, 3:].set(0)   # length 3
    tokens = tokens.at[2, 7:].set(0)   # length 7
    # rows 3..7 keep full length T

    fwd = jax.jit(recurrent_network_forward)
    probs = fwd(tokens, prep)
    jax.block_until_ready(probs)
    assert probs.shape == (B, N_CLS)
    print("KERNEL_OK")
</pallas_src>

<mosaic_0001>
module attributes {stable_mosaic.version = 11 : i64} {
  func.func @_rnn_kernel(%arg0: memref<8x1xi32, #tpu.memory_space<vmem>>, %arg1: memref<64x128xf32, #tpu.memory_space<vmem>>, %arg2: memref<128x128xbf16, #tpu.memory_space<vmem>>, %arg3: memref<128x128xbf16, #tpu.memory_space<vmem>>, %arg4: memref<1x128xf32, #tpu.memory_space<vmem>>, %arg5: memref<128x128xbf16, #tpu.memory_space<vmem>>, %arg6: memref<128x4xbf16, #tpu.memory_space<vmem>>, %arg7: memref<1x4xf32, #tpu.memory_space<vmem>>, %arg8: memref<8x4xf32, #tpu.memory_space<vmem>>) attributes {dimension_semantics = [], scalar_prefetch = 0 : i64, scratch_operands = 0 : i64, tpu.core_type = #tpu.core_type<tc>} {
    %c0 = arith.constant 0 : index
    %c0_0 = arith.constant 0 : index
    %0 = vector.load %arg0[%c0, %c0_0] : memref<8x1xi32, #tpu.memory_space<vmem>>, vector<8x1xi32>
    %c0_1 = arith.constant 0 : index
    %c0_2 = arith.constant 0 : index
    %1 = vector.load %arg2[%c0_1, %c0_2] : memref<128x128xbf16, #tpu.memory_space<vmem>>, vector<128x128xbf16>
    %cst = arith.constant 0.000000e+00 : f32
    %2 = vector.broadcast %cst : f32 to vector<8x128xf32>
    %c0_i32 = arith.constant 0 : i32
    %3 = vector.broadcast %c0_i32 : i32 to vector<8x1xi32>
    %4 = arith.cmpi sgt, %0, %3 : vector<8x1xi32>
    %c0_3 = arith.constant 0 : index
    %c0_4 = arith.constant 0 : index
    %5 = vector.load %arg1[%c0_3, %c0_4] : memref<64x128xf32, #tpu.memory_space<vmem>>, vector<8x128xf32>
    %6 = arith.truncf %2 : vector<8x128xf32> to vector<8x128xbf16>
    %cst_5 = arith.constant dense<0.000000e+00> : vector<8x128xf32>
    %7 = tpu.matmul %6, %1, %cst_5 {dimension_numbers = #tpu.dot_dimension_numbers<[1], [0], [0], [1], [0, 0, 1, 1], [], []>} : vector<8x128xbf16>, vector<128x128xbf16>, vector<8x128xf32> -> vector<8x128xf32>
    %8 = arith.addf %5, %7 : vector<8x128xf32>
    %9 = math.tanh %8 : vector<8x128xf32>
    %10 = vector.shape_cast %4 : vector<8x1xi1> to vector<8x1xi1>
    %11 = vector.broadcast %10 : vector<8x1xi1> to vector<8x128xi1>
    %12 = arith.select %11, %9, %2 : vector<8x128xi1>, vector<8x128xf32>
    %c1_i32 = arith.constant 1 : i32
    %13 = vector.broadcast %c1_i32 : i32 to vector<8x1xi32>
    %14 = arith.cmpi sgt, %0, %13 : vector<8x1xi32>
    %c8 = arith.constant 8 : index
    %c0_6 = arith.constant 0 : index
    %15 = vector.load %arg1[%c8, %c0_6] : memref<64x128xf32, #tpu.memory_space<vmem>>, vector<8x128xf32>
    %16 = arith.truncf %12 : vector<8x128xf32> to vector<8x128xbf16>
    %cst_7 = arith.constant dense<0.000000e+00> : vector<8x128xf32>
    %17 = tpu.matmul %16, %1, %cst_7 {dimension_numbers = #tpu.dot_dimension_numbers<[1], [0], [0], [1], [0, 0, 1, 1], [], []>} : vector<8x128xbf16>, vector<128x128xbf16>, vector<8x128xf32> -> vector<8x128xf32>
    %18 = arith.addf %15, %17 : vector<8x128xf32>
    %19 = math.tanh %18 : vector<8x128xf32>
    %20 = vector.shape_cast %14 : vector<8x1xi1> to vector<8x1xi1>
    %21 = vector.broadcast %20 : vector<8x1xi1> to vector<8x128xi1>
    %22 = arith.select %21, %19, %12 : vector<8x128xi1>, vector<8x128xf32>
    %c2_i32 = arith.constant 2 : i32
    %23 = vector.broadcast %c2_i32 : i32 to vector<8x1xi32>
    %24 = arith.cmpi sgt, %0, %23 : vector<8x1xi32>
    %c16 = arith.constant 16 : index
    %c0_8 = arith.constant 0 : index
    %25 = vector.load %arg1[%c16, %c0_8] : memref<64x128xf32, #tpu.memory_space<vmem>>, vector<8x128xf32>
    %26 = arith.truncf %22 : vector<8x128xf32> to vector<8x128xbf16>
    %cst_9 = arith.constant dense<0.000000e+00> : vector<8x128xf32>
    %27 = tpu.matmul %26, %1, %cst_9 {dimension_numbers = #tpu.dot_dimension_numbers<[1], [0], [0], [1], [0, 0, 1, 1], [], []>} : vector<8x128xbf16>, vector<128x128xbf16>, vector<8x128xf32> -> vector<8x128xf32>
    %28 = arith.addf %25, %27 : vector<8x128xf32>
    %29 = math.tanh %28 : vector<8x128xf32>
    %30 = vector.shape_cast %24 : vector<8x1xi1> to vector<8x1xi1>
    %31 = vector.broadcast %30 : vector<8x1xi1> to vector<8x128xi1>
    %32 = arith.select %31, %29, %22 : vector<8x128xi1>, vector<8x128xf32>
    %c3_i32 = arith.constant 3 : i32
    %33 = vector.broadcast %c3_i32 : i32 to vector<8x1xi32>
    %34 = arith.cmpi sgt, %0, %33 : vector<8x1xi32>
    %c24 = arith.constant 24 : index
    %c0_10 = arith.constant 0 : index
    %35 = vector.load %arg1[%c24, %c0_10] : memref<64x128xf32, #tpu.memory_space<vmem>>, vector<8x128xf32>
    %36 = arith.truncf %32 : vector<8x128xf32> to vector<8x128xbf16>
    %cst_11 = arith.constant dense<0.000000e+00> : vector<8x128xf32>
    %37 = tpu.matmul %36, %1, %cst_11 {dimension_numbers = #tpu.dot_dimension_numbers<[1], [0], [0], [1], [0, 0, 1, 1], [], []>} : vector<8x128xbf16>, vector<128x128xbf16>, vector<8x128xf32> -> vector<8x128xf32>
    %38 = arith.addf %35, %37 : vector<8x128xf32>
    %39 = math.tanh %38 : vector<8x128xf32>
    %40 = vector.shape_cast %34 : vector<8x1xi1> to vector<8x1xi1>
    %41 = vector.broadcast %40 : vector<8x1xi1> to vector<8x128xi1>
    %42 = arith.select %41, %39, %32 : vector<8x128xi1>, vector<8x128xf32>
    %c4_i32 = arith.constant 4 : i32
    %43 = vector.broadcast %c4_i32 : i32 to vector<8x1xi32>
    %44 = arith.cmpi sgt, %0, %43 : vector<8x1xi32>
    %c32 = arith.constant 32 : index
    %c0_12 = arith.constant 0 : index
    %45 = vector.load %arg1[%c32, %c0_12] : memref<64x128xf32, #tpu.memory_space<vmem>>, vector<8x128xf32>
    %46 = arith.truncf %42 : vector<8x128xf32> to vector<8x128xbf16>
    %cst_13 = arith.constant dense<0.000000e+00> : vector<8x128xf32>
    %47 = tpu.matmul %46, %1, %cst_13 {dimension_numbers = #tpu.dot_dimension_numbers<[1], [0], [0], [1], [0, 0, 1, 1], [], []>} : vector<8x128xbf16>, vector<128x128xbf16>, vector<8x128xf32> -> vector<8x128xf32>
    %48 = arith.addf %45, %47 : vector<8x128xf32>
    %49 = math.tanh %48 : vector<8x128xf32>
    %50 = vector.shape_cast %44 : vector<8x1xi1> to vector<8x1xi1>
    %51 = vector.broadcast %50 : vector<8x1xi1> to vector<8x128xi1>
    %52 = arith.select %51, %49, %42 : vector<8x128xi1>, vector<8x128xf32>
    %c5_i32 = arith.constant 5 : i32
    %53 = vector.broadcast %c5_i32 : i32 to vector<8x1xi32>
    %54 = arith.cmpi sgt, %0, %53 : vector<8x1xi32>
    %c40 = arith.constant 40 : index
    %c0_14 = arith.constant 0 : index
    %55 = vector.load %arg1[%c40, %c0_14] : memref<64x128xf32, #tpu.memory_space<vmem>>, vector<8x128xf32>
    %56 = arith.truncf %52 : vector<8x128xf32> to vector<8x128xbf16>
    %cst_15 = arith.constant dense<0.000000e+00> : vector<8x128xf32>
    %57 = tpu.matmul %56, %1, %cst_15 {dimension_numbers = #tpu.dot_dimension_numbers<[1], [0], [0], [1], [0, 0, 1, 1], [], []>} : vector<8x128xbf16>, vector<128x128xbf16>, vector<8x128xf32> -> vector<8x128xf32>
    %58 = arith.addf %55, %57 : vector<8x128xf32>
    %59 = math.tanh %58 : vector<8x128xf32>
    %60 = vector.shape_cast %54 : vector<8x1xi1> to vector<8x1xi1>
    %61 = vector.broadcast %60 : vector<8x1xi1> to vector<8x128xi1>
    %62 = arith.select %61, %59, %52 : vector<8x128xi1>, vector<8x128xf32>
    %c6_i32 = arith.constant 6 : i32
    %63 = vector.broadcast %c6_i32 : i32 to vector<8x1xi32>
    %64 = arith.cmpi sgt, %0, %63 : vector<8x1xi32>
    %c48 = arith.constant 48 : index
    %c0_16 = arith.constant 0 : index
    %65 = vector.load %arg1[%c48, %c0_16] : memref<64x128xf32, #tpu.memory_space<vmem>>, vector<8x128xf32>
    %66 = arith.truncf %62 : vector<8x128xf32> to vector<8x128xbf16>
    %cst_17 = arith.constant dense<0.000000e+00> : vector<8x128xf32>
    %67 = tpu.matmul %66, %1, %cst_17 {dimension_numbers = #tpu.dot_dimension_numbers<[1], [0], [0], [1], [0, 0, 1, 1], [], []>} : vector<8x128xbf16>, vector<128x128xbf16>, vector<8x128xf32> -> vector<8x128xf32>
    %68 = arith.addf %65, %67 : vector<8x128xf32>
    %69 = math.tanh %68 : vector<8x128xf32>
    %70 = vector.shape_cast %64 : vector<8x1xi1> to vector<8x1xi1>
    %71 = vector.broadcast %70 : vector<8x1xi1> to vector<8x128xi1>
    %72 = arith.select %71, %69, %62 : vector<8x128xi1>, vector<8x128xf32>
    %c7_i32 = arith.constant 7 : i32
    %73 = vector.broadcast %c7_i32 : i32 to vector<8x1xi32>
    %74 = arith.cmpi sgt, %0, %73 : vector<8x1xi32>
    %c56 = arith.constant 56 : index
    %c0_18 = arith.constant 0 : index
    %75 = vector.load %arg1[%c56, %c0_18] : memref<64x128xf32, #tpu.memory_space<vmem>>, vector<8x128xf32>
    %76 = arith.truncf %72 : vector<8x128xf32> to vector<8x128xbf16>
    %cst_19 = arith.constant dense<0.000000e+00> : vector<8x128xf32>
    %77 = tpu.matmul %76, %1, %cst_19 {dimension_numbers = #tpu.dot_dimension_numbers<[1], [0], [0], [1], [0, 0, 1, 1], [], []>} : vector<8x128xbf16>, vector<128x128xbf16>, vector<8x128xf32> -> vector<8x128xf32>
    %78 = arith.addf %75, %77 : vector<8x128xf32>
    %79 = math.tanh %78 : vector<8x128xf32>
    %80 = vector.shape_cast %74 : vector<8x1xi1> to vector<8x1xi1>
    %81 = vector.broadcast %80 : vector<8x1xi1> to vector<8x128xi1>
    %82 = arith.select %81, %79, %72 : vector<8x128xi1>, vector<8x128xf32>
    %83 = tpu.concatenate %12, %22, %32, %42, %52, %62, %72, %82 in 0 : vector<8x128xf32>, vector<8x128xf32>, vector<8x128xf32>, vector<8x128xf32>, vector<8x128xf32>, vector<8x128xf32>, vector<8x128xf32>, vector<8x128xf32> -> vector<64x128xf32>
    %84 = arith.truncf %83 : vector<64x128xf32> to vector<64x128xbf16>
    %c0_20 = arith.constant 0 : index
    %c0_21 = arith.constant 0 : index
    %85 = vector.load %arg3[%c0_20, %c0_21] : memref<128x128xbf16, #tpu.memory_space<vmem>>, vector<128x128xbf16>
    %cst_22 = arith.constant dense<0.000000e+00> : vector<64x128xf32>
    %86 = tpu.matmul %84, %85, %cst_22 {dimension_numbers = #tpu.dot_dimension_numbers<[1], [0], [0], [1], [0, 0, 1, 1], [], []>} : vector<64x128xbf16>, vector<128x128xbf16>, vector<64x128xf32> -> vector<64x128xf32>
    %c0_23 = arith.constant 0 : index
    %c0_24 = arith.constant 0 : index
    %87 = vector.load %arg4[%c0_23, %c0_24] : memref<1x128xf32, #tpu.memory_space<vmem>>, vector<1x128xf32>
    %88 = vector.broadcast %87 : vector<1x128xf32> to vector<64x128xf32>
    %89 = arith.addf %86, %88 : vector<64x128xf32>
    %c0_25 = arith.constant 0 : index
    %c0_26 = arith.constant 0 : index
    %90 = vector.load %arg5[%c0_25, %c0_26] : memref<128x128xbf16, #tpu.memory_space<vmem>>, vector<128x128xbf16>
    %cst_27 = arith.constant 0.000000e+00 : f32
    %91 = vector.broadcast %cst_27 : f32 to vector<8x128xf32>
    %c0_i32_28 = arith.constant 0 : i32
    %92 = vector.broadcast %c0_i32_28 : i32 to vector<8x1xi32>
    %93 = arith.cmpi sgt, %0, %92 : vector<8x1xi32>
    %94 = vector.extract_strided_slice %89 {offsets = [0, 0], sizes = [8, 128], strides = [1, 1]} : vector<64x128xf32> to vector<8x128xf32>
    %95 = arith.truncf %91 : vector<8x128xf32> to vector<8x128xbf16>
    %cst_29 = arith.constant dense<0.000000e+00> : vector<8x128xf32>
    %96 = tpu.matmul %95, %90, %cst_29 {dimension_numbers = #tpu.dot_dimension_numbers<[1], [0], [0], [1], [0, 0, 1, 1], [], []>} : vector<8x128xbf16>, vector<128x128xbf16>, vector<8x128xf32> -> vector<8x128xf32>
    %97 = arith.addf %94, %96 : vector<8x128xf32>
    %98 = math.tanh %97 : vector<8x128xf32>
    %99 = vector.shape_cast %93 : vector<8x1xi1> to vector<8x1xi1>
    %100 = vector.broadcast %99 : vector<8x1xi1> to vector<8x128xi1>
    %101 = arith.select %100, %98, %91 : vector<8x128xi1>, vector<8x128xf32>
    %c1_i32_30 = arith.constant 1 : i32
    %102 = vector.broadcast %c1_i32_30 : i32 to vector<8x1xi32>
    %103 = arith.cmpi sgt, %0, %102 : vector<8x1xi32>
    %104 = vector.extract_strided_slice %89 {offsets = [8, 0], sizes = [8, 128], strides = [1, 1]} : vector<64x128xf32> to vector<8x128xf32>
    %105 = arith.truncf %101 : vector<8x128xf32> to vector<8x128xbf16>
    %cst_31 = arith.constant dense<0.000000e+00> : vector<8x128xf32>
    %106 = tpu.matmul %105, %90, %cst_31 {dimension_numbers = #tpu.dot_dimension_numbers<[1], [0], [0], [1], [0, 0, 1, 1], [], []>} : vector<8x128xbf16>, vector<128x128xbf16>, vector<8x128xf32> -> vector<8x128xf32>
    %107 = arith.addf %104, %106 : vector<8x128xf32>
    %108 = math.tanh %107 : vector<8x128xf32>
    %109 = vector.shape_cast %103 : vector<8x1xi1> to vector<8x1xi1>
    %110 = vector.broadcast %109 : vector<8x1xi1> to vector<8x128xi1>
    %111 = arith.select %110, %108, %101 : vector<8x128xi1>, vector<8x128xf32>
    %c2_i32_32 = arith.constant 2 : i32
    %112 = vector.broadcast %c2_i32_32 : i32 to vector<8x1xi32>
    %113 = arith.cmpi sgt, %0, %112 : vector<8x1xi32>
    %114 = vector.extract_strided_slice %89 {offsets = [16, 0], sizes = [8, 128], strides = [1, 1]} : vector<64x128xf32> to vector<8x128xf32>
    %115 = arith.truncf %111 : vector<8x128xf32> to vector<8x128xbf16>
    %cst_33 = arith.constant dense<0.000000e+00> : vector<8x128xf32>
    %116 = tpu.matmul %115, %90, %cst_33 {dimension_numbers = #tpu.dot_dimension_numbers<[1], [0], [0], [1], [0, 0, 1, 1], [], []>} : vector<8x128xbf16>, vector<128x128xbf16>, vector<8x128xf32> -> vector<8x128xf32>
    %117 = arith.addf %114, %116 : vector<8x128xf32>
    %118 = math.tanh %117 : vector<8x128xf32>
    %119 = vector.shape_cast %113 : vector<8x1xi1> to vector<8x1xi1>
    %120 = vector.broadcast %119 : vector<8x1xi1> to vector<8x128xi1>
    %121 = arith.select %120, %118, %111 : vector<8x128xi1>, vector<8x128xf32>
    %c3_i32_34 = arith.constant 3 : i32
    %122 = vector.broadcast %c3_i32_34 : i32 to vector<8x1xi32>
    %123 = arith.cmpi sgt, %0, %122 : vector<8x1xi32>
    %124 = vector.extract_strided_slice %89 {offsets = [24, 0], sizes = [8, 128], strides = [1, 1]} : vector<64x128xf32> to vector<8x128xf32>
    %125 = arith.truncf %121 : vector<8x128xf32> to vector<8x128xbf16>
    %cst_35 = arith.constant dense<0.000000e+00> : vector<8x128xf32>
    %126 = tpu.matmul %125, %90, %cst_35 {dimension_numbers = #tpu.dot_dimension_numbers<[1], [0], [0], [1], [0, 0, 1, 1], [], []>} : vector<8x128xbf16>, vector<128x128xbf16>, vector<8x128xf32> -> vector<8x128xf32>
    %127 = arith.addf %124, %126 : vector<8x128xf32>
    %128 = math.tanh %127 : vector<8x128xf32>
    %129 = vector.shape_cast %123 : vector<8x1xi1> to vector<8x1xi1>
    %130 = vector.broadcast %129 : vector<8x1xi1> to vector<8x128xi1>
    %131 = arith.select %130, %128, %121 : vector<8x128xi1>, vector<8x128xf32>
    %c4_i32_36 = arith.constant 4 : i32
    %132 = vector.broadcast %c4_i32_36 : i32 to vector<8x1xi32>
    %133 = arith.cmpi sgt, %0, %132 : vector<8x1xi32>
    %134 = vector.extract_strided_slice %89 {offsets = [32, 0], sizes = [8, 128], strides = [1, 1]} : vector<64x128xf32> to vector<8x128xf32>
    %135 = arith.truncf %131 : vector<8x128xf32> to vector<8x128xbf16>
    %cst_37 = arith.constant dense<0.000000e+00> : vector<8x128xf32>
    %136 = tpu.matmul %135, %90, %cst_37 {dimension_numbers = #tpu.dot_dimension_numbers<[1], [0], [0], [1], [0, 0, 1, 1], [], []>} : vector<8x128xbf16>, vector<128x128xbf16>, vector<8x128xf32> -> vector<8x128xf32>
    %137 = arith.addf %134, %136 : vector<8x128xf32>
    %138 = math.tanh %137 : vector<8x128xf32>
    %139 = vector.shape_cast %133 : vector<8x1xi1> to vector<8x1xi1>
    %140 = vector.broadcast %139 : vector<8x1xi1> to vector<8x128xi1>
    %141 = arith.select %140, %138, %131 : vector<8x128xi1>, vector<8x128xf32>
    %c5_i32_38 = arith.constant 5 : i32
    %142 = vector.broadcast %c5_i32_38 : i32 to vector<8x1xi32>
    %143 = arith.cmpi sgt, %0, %142 : vector<8x1xi32>
    %144 = vector.extract_strided_slice %89 {offsets = [40, 0], sizes = [8, 128], strides = [1, 1]} : vector<64x128xf32> to vector<8x128xf32>
    %145 = arith.truncf %141 : vector<8x128xf32> to vector<8x128xbf16>
    %cst_39 = arith.constant dense<0.000000e+00> : vector<8x128xf32>
    %146 = tpu.matmul %145, %90, %cst_39 {dimension_numbers = #tpu.dot_dimension_numbers<[1], [0], [0], [1], [0, 0, 1, 1], [], []>} : vector<8x128xbf16>, vector<128x128xbf16>, vector<8x128xf32> -> vector<8x128xf32>
    %147 = arith.addf %144, %146 : vector<8x128xf32>
    %148 = math.tanh %147 : vector<8x128xf32>
    %149 = vector.shape_cast %143 : vector<8x1xi1> to vector<8x1xi1>
    %150 = vector.broadcast %149 : vector<8x1xi1> to vector<8x128xi1>
    %151 = arith.select %150, %148, %141 : vector<8x128xi1>, vector<8x128xf32>
    %c6_i32_40 = arith.constant 6 : i32
    %152 = vector.broadcast %c6_i32_40 : i32 to vector<8x1xi32>
    %153 = arith.cmpi sgt, %0, %152 : vector<8x1xi32>
    %154 = vector.extract_strided_slice %89 {offsets = [48, 0], sizes = [8, 128], strides = [1, 1]} : vector<64x128xf32> to vector<8x128xf32>
    %155 = arith.truncf %151 : vector<8x128xf32> to vector<8x128xbf16>
    %cst_41 = arith.constant dense<0.000000e+00> : vector<8x128xf32>
    %156 = tpu.matmul %155, %90, %cst_41 {dimension_numbers = #tpu.dot_dimension_numbers<[1], [0], [0], [1], [0, 0, 1, 1], [], []>} : vector<8x128xbf16>, vector<128x128xbf16>, vector<8x128xf32> -> vector<8x128xf32>
    %157 = arith.addf %154, %156 : vector<8x128xf32>
    %158 = math.tanh %157 : vector<8x128xf32>
    %159 = vector.shape_cast %153 : vector<8x1xi1> to vector<8x1xi1>
    %160 = vector.broadcast %159 : vector<8x1xi1> to vector<8x128xi1>
    %161 = arith.select %160, %158, %151 : vector<8x128xi1>, vector<8x128xf32>
    %c7_i32_42 = arith.constant 7 : i32
    %162 = vector.broadcast %c7_i32_42 : i32 to vector<8x1xi32>
    %163 = arith.cmpi sgt, %0, %162 : vector<8x1xi32>
    %164 = vector.extract_strided_slice %89 {offsets = [56, 0], sizes = [8, 128], strides = [1, 1]} : vector<64x128xf32> to vector<8x128xf32>
    %165 = arith.truncf %161 : vector<8x128xf32> to vector<8x128xbf16>
    %cst_43 = arith.constant dense<0.000000e+00> : vector<8x128xf32>
    %166 = tpu.matmul %165, %90, %cst_43 {dimension_numbers = #tpu.dot_dimension_numbers<[1], [0], [0], [1], [0, 0, 1, 1], [], []>} : vector<8x128xbf16>, vector<128x128xbf16>, vector<8x128xf32> -> vector<8x128xf32>
    %167 = arith.addf %164, %166 : vector<8x128xf32>
    %168 = math.tanh %167 : vector<8x128xf32>
    %169 = vector.shape_cast %163 : vector<8x1xi1> to vector<8x1xi1>
    %170 = vector.broadcast %169 : vector<8x1xi1> to vector<8x128xi1>
    %171 = arith.select %170, %168, %161 : vector<8x128xi1>, vector<8x128xf32>
    %172 = arith.truncf %171 : vector<8x128xf32> to vector<8x128xbf16>
    %c0_44 = arith.constant 0 : index
    %c0_45 = arith.constant 0 : index
    %173 = vector.load %arg6[%c0_44, %c0_45] : memref<128x4xbf16, #tpu.memory_space<vmem>>, vector<128x4xbf16>
    %cst_46 = arith.constant dense<0.000000e+00> : vector<8x4xf32>
    %174 = tpu.matmul %172, %173, %cst_46 {dimension_numbers = #tpu.dot_dimension_numbers<[1], [0], [0], [1], [0, 0, 1, 1], [], []>} : vector<8x128xbf16>, vector<128x4xbf16>, vector<8x4xf32> -> vector<8x4xf32>
    %c0_47 = arith.constant 0 : index
    %c0_48 = arith.constant 0 : index
    %175 = vector.load %arg7[%c0_47, %c0_48] : memref<1x4xf32, #tpu.memory_space<vmem>>, vector<1x4xf32>
    %176 = vector.broadcast %175 : vector<1x4xf32> to vector<8x4xf32>
    %177 = arith.addf %174, %176 : vector<8x4xf32>
    %cst_49 = arith.constant dense<0xFF800000> : vector<8xf32>
    %178 = vector.multi_reduction <maximumf>, %177, %cst_49 [1] : vector<8x4xf32> to vector<8xf32>
    %179 = vector.shape_cast %178 : vector<8xf32> to vector<8x1xf32>
    %180 = vector.broadcast %179 : vector<8x1xf32> to vector<8x4xf32>
    %181 = arith.subf %177, %180 : vector<8x4xf32>
    %182 = math.exp %181 : vector<8x4xf32>
    %cst_50 = arith.constant dense<0.000000e+00> : vector<8xf32>
    %183 = vector.multi_reduction <add>, %182, %cst_50 [1] : vector<8x4xf32> to vector<8xf32>
    %184 = vector.shape_cast %183 : vector<8xf32> to vector<8x1xf32>
    %185 = vector.broadcast %184 : vector<8x1xf32> to vector<8x4xf32>
    %186 = arith.divf %182, %185 : vector<8x4xf32>
    %c0_51 = arith.constant 0 : index
    %c0_52 = arith.constant 0 : index
    %187 = vector.load %arg8[%c0_51, %c0_52] : memref<8x4xf32, #tpu.memory_space<vmem>>, vector<8x4xf32>
    tpu.vector_store %arg8[%c0_51, %c0_52], %186 {strides = array<i32>} : memref<8x4xf32, #tpu.memory_space<vmem>>, vector<8x4xf32>,
    return
  }
}

</mosaic_0001>

<bundles_post_ra>
// kernel: recurrent_network_forward.1
= control target key start
LH: loop header
LB: loop body
LE: loop exit
PB: predicated region body
PF: predicated region fallthrough
CT: control target
= control target key end

     0   :  { %v1832_v0 = vmov 0.0   ;;  %vm1833_vm0 = vmmov 0   ;;  %v1834_v2 = vmov 0   ;;  %s2501_s2 = inlined_call_operand.vmem [shape: bf16[128,128], index: 2, kind: input, shape index: {}]   ;;  %s2502_s0 = inlined_call_operand.vmem [shape: s32[8,1], index: 0, kind: input, shape index: {}]   ;;  %s2503_s1 = inlined_call_operand.vmem [shape: f32[64,128], index: 1, kind: input, shape index: {}]   ;;  %s2504_s3 = inlined_call_operand.vmem [shape: bf16[128,128], index: 3, kind: input, shape index: {}]   ;;  %s2505_s5 = inlined_call_operand.vmem [shape: bf16[128,128], index: 5, kind: input, shape index: {}]   ;;  %s2506_s4 = inlined_call_operand.vmem [shape: f32[1,128], index: 4, kind: input, shape index: {}]   ;;  %s2507_s6 = inlined_call_operand.vmem [shape: bf16[128,4], index: 6, kind: input, shape index: {}]   ;;  %s2508_s7 = inlined_call_operand.vmem [shape: f32[1,4], index: 7, kind: input, shape index: {}]   ;;  %s2509_s8 = inlined_call_operand.vmem [shape: f32[8,4], index: 8, kind: output, shape index: {}]  }
   0x1   :  { %1394 = vmatprep.subr.bf16.mxu0 %v1832_v0  ;;  %v1885_v1 = vld [vmem:[%s2501_s2 + $0x38] sm:$0xff]   ;;  %1410 = vmatprep.mubr.msk.bf16.mxu0 %vm1833_vm0, %v1832_v0  ;;  %v1895_v3 = vld [vmem:[%s2501_s2 + $0x30] sm:$0xff]   ;;  %v1907_v4 = vld [vmem:[%s2501_s2 + $0x28] sm:$0xff]  }
   0x2   :  { %1762 = vset.pattern.permute.xlu0 %v1834_v2  ;;  %1414 = vmatprep.subr.bf16.mxu1 %v1832_v0  ;;  %v1915_v5 = vld [vmem:[%s2502_s0] sm:$0xff]  ;;  %v1935_v9 = vld [vmem:[%s2501_s2 + $0x18] sm:$0xff]   ;;  %v1946_v11 = vld [vmem:[%s2501_s2 + $0x10] sm:$0xff]  }
   0x3   :  { %1395 = vmatpush3.bf16.msra.mxu0 %v1885_v1  ;;  %1415 = vmatpush3.bf16.msra.mxu1 %v1885_v1  ;;  %vm47_vm1 = vcmp.gt.s32.totalorder %v1915_v5, 0  ;;  %vm145_vm2 = vcmp.gt.s32.totalorder %v1915_v5, 1  ;;  %v1923_v6 = vld [vmem:[%s2501_s2 + $0x20] sm:$0xff]   ;;  %vm298_vm3 = vcmp.gt.s32.totalorder %v1915_v5, 4  ;;  %vm400_vm4 = vcmp.gt.s32.totalorder %v1915_v5, 6  ;;  %v1956_v13 = vld [vmem:[%s2501_s2 + $0x8] sm:$0xff]  }
   0x4   :  { %1396 = vmatprep.subr.bf16.mxu0 %v1832_v0  ;;  %1416 = vmatprep.subr.bf16.mxu1 %v1832_v0  ;;  %v139_v7 = vsel %vm47_vm1, 1, %v1834_v2  ;;  %v190_v8 = vsel %vm145_vm2, 1, %v1834_v2  ;;  %v343_v10 = vsel %vm298_vm3, 1, %v1834_v2  ;;  %v445_v12 = vsel %vm400_vm4, 1, %v1834_v2  ;;  %v1965_v14 = vld [vmem:[%s2501_s2] sm:$0xff]   ;;  %v146_v29 = vld [vmem:[%s2503_s1 + $0x8] sm:$0xff] }
   0x5   :  { %1430 = vmatprep.mubr.msk.bf16.mxu1 %vm1833_vm0, %v1832_v0  ;;  %1763 = vset.pattern.permute.xlu1 %v1834_v2  ;;  %v48_v15 = vld [vmem:[%s2503_s1] sm:$0xff]  ;;  %vm196_vm7 = vcmp.gt.s32.totalorder %v1915_v5, 2  ;;  %vm247_vm8 = vcmp.gt.s32.totalorder %v1915_v5, 3  ;;  %vm349_vm9 = vcmp.gt.s32.totalorder %v1915_v5, 5  ;;  %vm451_vm10 = vcmp.gt.s32.totalorder %v1915_v5, 7  ;;  %v197_v40 = vld [vmem:[%s2503_s1 + $0x10] sm:$0xff] }
   0x6   :  { %141 = vperm.xlu0 %1762, %v139_v7   ;;  %v241_v25 = vsel %vm196_vm7, 1, %v1834_v2  ;;  %v292_v26 = vsel %vm247_vm8, 1, %v1834_v2  ;;  %v394_v27 = vsel %vm349_vm9, 1, %v1834_v2  ;;  %v496_v28 = vsel %vm451_vm10, 1, %v1834_v2  ;;  %v248_v50 = vld [vmem:[%s2503_s1 + $0x18] sm:$0xff]  ;;  %v299_v60 = vld [vmem:[%s2503_s1 + $0x20] sm:$0xff] }
   0x7   :  { %1397 = vmatpush3.bf16.msra.mxu0 %v1895_v3  ;;  %1417 = vmatpush3.bf16.msra.mxu1 %v1895_v3  ;;  %vm1835_vm1 = vmmov 1  }
   0x8   :  { %1398 = vmatprep.subr.bf16.mxu0 %v1832_v0  ;;  %1418 = vmatprep.subr.bf16.mxu1 %v1832_v0 }
   0x9   :  { %243 = vperm.xlu1 %1763, %v241_v25   ;;  %v1775_v25 = vld [vmem:[%s2504_s3 + $0x20] sm:$0xff]  }
   0xa   :  { %192 = vperm.xlu0 %1762, %v190_v8  }
   0xb   :  { %1399 = vmatpush3.bf16.msra.mxu0 %v1907_v4  ;;  %1419 = vmatpush3.bf16.msra.mxu1 %v1907_v4 }
   0xc   :  { %1400 = vmatprep.subr.bf16.mxu0 %v1832_v0  ;;  %1420 = vmatprep.subr.bf16.mxu1 %v1832_v0 }
   0xd   :  { %294 = vperm.xlu1 %1763, %v292_v26   ;;  %v1777_v26 = vld [vmem:[%s2504_s3 + $0x10] sm:$0xff]  }
   0xe   :  { %345 = vperm.xlu0 %1762, %v343_v10  }
   0xf   :  { %1401 = vmatpush3.bf16.msra.mxu0 %v1923_v6  ;;  %1421 = vmatpush3.bf16.msra.mxu1 %v1923_v6 }
  0x10   :  { %1402 = vmatprep.subr.bf16.mxu0 %v1832_v0  ;;  %1422 = vmatprep.subr.bf16.mxu1 %v1832_v0 }
  0x11   :  { %396 = vperm.xlu1 %1763, %v394_v27   ;;  %v1778_v27 = vld [vmem:[%s2504_s3 + $0x8] sm:$0xff]  }
  0x12   :  { %447 = vperm.xlu0 %1762, %v445_v12  }
  0x13   :  { %1403 = vmatpush3.bf16.msra.mxu0 %v1935_v9  ;;  %1423 = vmatpush3.bf16.msra.mxu1 %v1935_v9 }
  0x14   :  { %1404 = vmatprep.subr.bf16.mxu0 %v1832_v0  ;;  %1424 = vmatprep.subr.bf16.mxu1 %v1832_v0 }
  0x15   :  { %498 = vperm.xlu1 %1763, %v496_v28   ;;  %v1779_v28 = vld [vmem:[%s2504_s3] sm:$0xff]  }
  0x17   :  { %1405 = vmatpush3.bf16.msra.mxu0 %v1946_v11  ;;  %1425 = vmatpush3.bf16.msra.mxu1 %v1946_v11 }
  0x18   :  { %1406 = vmatprep.subr.bf16.mxu0 %v1832_v0  ;;  %1426 = vmatprep.subr.bf16.mxu1 %v1832_v0 }
  0x1b   :  { %1407 = vmatpush3.bf16.msra.mxu0 %v1956_v13  ;;  %1427 = vmatpush3.bf16.msra.mxu1 %v1956_v13 }
  0x1c   :  { %1408 = vmatprep.subr.bf16.mxu0 %v1832_v0  ;;  %1428 = vmatprep.subr.bf16.mxu1 %v1832_v0 }
  0x1f   :  { %1409 = vmatpush3.bf16.msra.mxu0 %v1965_v14  ;;  %1429 = vmatpush3.bf16.msra.mxu1 %v1965_v14 }
  0x20   :  { %1434 = vmatprep.subr.bf16.mxu0 %v1832_v0  ;;  %1454 = vmatprep.subr.bf16.mxu1 %v1832_v0 }
  0x22   :  { %1411 = vmatmul.mubr.bf16.vlgmr.msra.gmra.mxu0 %v1834_v2 }
  0x23   :  { %1435 = vmatpush3.bf16.msra.mxu0 %v1885_v1  ;;  %1450 = vmatprep.mubr.msk.bf16.mxu0 %vm1833_vm0, %v1832_v0 }
  0x24   :  { %1436 = vmatprep.subr.bf16.mxu0 %v1832_v0 }
  0x27   :  { %1437 = vmatpush3.bf16.msra.mxu0 %v1895_v3 }
  0x28   :  { %1438 = vmatprep.subr.bf16.mxu0 %v1832_v0 }
  0x2b   :  { %1439 = vmatpush3.bf16.msra.mxu0 %v1907_v4 }
  0x2c   :  { %1440 = vmatprep.subr.bf16.mxu0 %v1832_v0 }
  0x2f   :  { %1441 = vmatpush3.bf16.msra.mxu0 %v1923_v6 }
  0x30   :  { %1442 = vmatprep.subr.bf16.mxu0 %v1832_v0 }
  0x33   :  { %1443 = vmatpush3.bf16.msra.mxu0 %v1935_v9 }
  0x34   :  { %1444 = vmatprep.subr.bf16.mxu0 %v1832_v0 }
  0x37   :  { %1445 = vmatpush3.bf16.msra.mxu0 %v1946_v11 }
  0x38   :  { %1446 = vmatprep.subr.bf16.mxu0 %v1832_v0 }
  0x3b   :  { %1447 = vmatpush3.bf16.msra.mxu0 %v1956_v13 }
  0x3c   :  { %1448 = vmatprep.subr.bf16.mxu0 %v1832_v0 }
  0x3f   :  { %1449 = vmatpush3.bf16.msra.mxu0 %v1965_v14 }
  0x40   :  { %1474 = vmatprep.subr.bf16.mxu0 %v1832_v0 }
  0x81   :  { %v1996_v21 = vpop.permute.xlu0 %141 }
  0x82   :  { %vm143_vm5 = vcmp.eq.s32.totalorder %v1996_v21, 1 }
  0x83   :  { %vm2004_vm6 = vmpackc.low %vm143_vm5, %vm143_vm5 }
  0x84   :  { %v2074_v46 = vpop.permute.xlu1 %243  ;;  %vm1206_vm2 = vmpackc.low %vm1835_vm1, %vm143_vm5 }
  0x85   :  { %v2041_v35 = vpop.permute.xlu0 %192  ;;  %vm245_vm12 = vcmp.eq.s32.totalorder %v2074_v46, 1 }
  0x86   :  { %vm194_vm11 = vcmp.eq.s32.totalorder %v2041_v35, 1 }
  0x88   :  { %v2105_v56 = vpop.permute.xlu1 %294 }
  0x89   :  { %vm296_vm13 = vcmp.eq.s32.totalorder %v2105_v56, 1  ;;  %v2135_v8 = vpop.permute.xlu0 %345 }
  0x8a   :  { %vm347_vm14 = vcmp.eq.s32.totalorder %v2135_v8, 1 }
  0xe2   :  { %v131_v16 = vpop.f32.mrf.mxu0 }
  0xe3   :  { %v137_v17 = vadd.f32 %v131_v16, %v48_v15  ;;  %v2169_v16 = vpop.permute.xlu1 %396 }
  0xe4   :  { %v1412_v18 = vpop.f32.mrf.mxu0  ;;  %vm398_vm15 = vcmp.eq.s32.totalorder %v2169_v16, 1  ;;  %v1790_v16 = vld [vmem:[%s2507_s6 + $0x28] sm:$0xff]  }
  0xe5   :  { %1796 = vtanh.f32 %v137_v17 }
  0xe6   :  { %v134_v19 = vpop.f32.mrf.mxu0 }
  0xe7   :  { %v1773_v19 = vld [vmem:[%s2504_s3 + $0x30] sm:$0xff]  }
  0xe8   :  { %v1413_v20 = vpop.f32.mrf.mxu0 }
  0xf2   :  { %v1999_v22 = vpop.eup %1796 }
  0xf3   :  { %v1195_v24 = vpack.c.bf16 %v1999_v22, %v1999_v22  ;;  %v144_v37 = vsel %vm143_vm5, %v1999_v22, 0.0 }
  0xf5   :  { %1431 = vmatmul.mubr.msk.bf16.vlgmr.msra.gmra.mxu1 %vm2004_vm6, %v1195_v24  ;;  %v1774_v24 = vld [vmem:[%s2504_s3 + $0x28] sm:$0xff]  }
  0xf6   :  { %1455 = vmatpush3.bf16.msra.mxu1 %v1885_v1  ;;  %1470 = vmatprep.mubr.msk.bf16.mxu1 %vm1833_vm0, %v1832_v0 }
  0xf7   :  { %1456 = vmatprep.subr.bf16.mxu1 %v1832_v0 }
  0xfa   :  { %1457 = vmatpush3.bf16.msra.mxu1 %v1895_v3 }
  0xfb   :  { %1458 = vmatprep.subr.bf16.mxu1 %v1832_v0 }
  0xfe   :  { %1459 = vmatpush3.bf16.msra.mxu1 %v1907_v4 }
  0xff   :  { %1460 = vmatprep.subr.bf16.mxu1 %v1832_v0 }
 0x102   :  { %1461 = vmatpush3.bf16.msra.mxu1 %v1923_v6 }
 0x103   :  { %1462 = vmatprep.subr.bf16.mxu1 %v1832_v0 }
 0x106   :  { %1463 = vmatpush3.bf16.msra.mxu1 %v1935_v9 }
 0x107   :  { %1464 = vmatprep.subr.bf16.mxu1 %v1832_v0 }
 0x10a   :  { %1465 = vmatpush3.bf16.msra.mxu1 %v1946_v11 }
 0x10b   :  { %1466 = vmatprep.subr.bf16.mxu1 %v1832_v0 }
 0x10e   :  { %1467 = vmatpush3.bf16.msra.mxu1 %v1956_v13 }
 0x10f   :  { %1468 = vmatprep.subr.bf16.mxu1 %v1832_v0 }
 0x112   :  { %1469 = vmatpush3.bf16.msra.mxu1 %v1965_v14 }
 0x113   :  { %1494 = vmatprep.subr.bf16.mxu1 %v1832_v0 }
 0x1b5   :  { %v182_v30 = vpop.f32.mrf.mxu1 }
 0x1b6   :  { %v188_v31 = vadd.f32 %v182_v30, %v146_v29 }
 0x1b7   :  { %v1432_v32 = vpop.f32.mrf.mxu1 }
 0x1b8   :  { %1798 = vtanh.f32 %v188_v31  ;;  %v2212_v31 = vld [vmem:[%s2505_s5 + $0x38] sm:$0xff]   ;;  %v2218_v32 = vld [vmem:[%s2505_s5 + $0x30] sm:$0xff]  }
 0x1b9   :  { %v185_v33 = vpop.f32.mrf.mxu1 }
 0x1ba   :  { %v2226_v33 = vld [vmem:[%s2505_s5 + $0x28] sm:$0xff]  }
 0x1bb   :  { %v1433_v34 = vpop.f32.mrf.mxu1 }
 0x1bc   :  { %v2233_v34 = vld [vmem:[%s2505_s5 + $0x20] sm:$0xff]  }
 0x1c5   :  { %v1799_v36 = vpop.eup %1798 }
 0x1c6   :  { %v2049_v38 = vsel %vm194_vm11, %v1799_v36, %v144_v37  ;;  %v2240_v36 = vld [vmem:[%s2505_s5 + $0x18] sm:$0xff]   ;;  %v2247_v37 = vld [vmem:[%s2505_s5 + $0x10] sm:$0xff]  }
 0x1c7   :  { %v198_v39 = vpack.c.bf16 %v2049_v38, %v2049_v38  ;;  %v1207_v20 = vpack.c.bf16 %v2049_v38, %v1999_v22  ;;  %v1776_v22 = vld [vmem:[%s2504_s3 + $0x18] sm:$0xff]  }
 0x1c9   :  { %1451 = vmatmul.mubr.bf16.vlgmr.msra.gmra.mxu0 %v198_v39  ;;  %v2261_v39 = vld [vmem:[%s2505_s5] sm:$0xff]  }
 0x1ca   :  { %1475 = vmatpush3.bf16.msra.mxu0 %v1885_v1  ;;  %1490 = vmatprep.mubr.msk.bf16.mxu0 %vm1833_vm0, %v1832_v0 }
 0x1cb   :  { %1476 = vmatprep.subr.bf16.mxu0 %v1832_v0 }
 0x1ce   :  { %1477 = vmatpush3.bf16.msra.mxu0 %v1895_v3 }
 0x1cf   :  { %1478 = vmatprep.subr.bf16.mxu0 %v1832_v0 }
 0x1d2   :  { %1479 = vmatpush3.bf16.msra.mxu0 %v1907_v4 }
 0x1d3   :  { %1480 = vmatprep.subr.bf16.mxu0 %v1832_v0 }
 0x1d6   :  { %1481 = vmatpush3.bf16.msra.mxu0 %v1923_v6 }
 0x1d7   :  { %1482 = vmatprep.subr.bf16.mxu0 %v1832_v0 }
 0x1da   :  { %1483 = vmatpush3.bf16.msra.mxu0 %v1935_v9 }
 0x1db   :  { %1484 = vmatprep.subr.bf16.mxu0 %v1832_v0 }
 0x1de   :  { %1485 = vmatpush3.bf16.msra.mxu0 %v1946_v11 }
 0x1df   :  { %1486 = vmatprep.subr.bf16.mxu0 %v1832_v0 }
 0x1e2   :  { %1487 = vmatpush3.bf16.msra.mxu0 %v1956_v13 }
 0x1e3   :  { %1488 = vmatprep.subr.bf16.mxu0 %v1832_v0 }
 0x1e6   :  { %1489 = vmatpush3.bf16.msra.mxu0 %v1965_v14 }
 0x1e7   :  { %1514 = vmatprep.subr.bf16.mxu0 %v1832_v0 }
 0x289   :  { %v233_v41 = vpop.f32.mrf.mxu0 }
 0x28a   :  { %v239_v42 = vadd.f32 %v233_v41, %v197_v40  ;;  %v401_v40 = vld [vmem:[%s2503_s1 + $0x30] sm:$0xff] }
 0x28b   :  { %v1452_v43 = vpop.f32.mrf.mxu0 }
 0x28c   :  { %1800 = vtanh.f32 %v239_v42 }
 0x28d   :  { %v236_v44 = vpop.f32.mrf.mxu0 }
 0x28f   :  { %v1453_v45 = vpop.f32.mrf.mxu0 }
 0x299   :  { %v1801_v47 = vpop.eup %1800 }
 0x29a   :  { %v2080_v48 = vsel %vm245_vm12, %v1801_v47, %v2049_v38  ;;  %v2254_v38 = vld [vmem:[%s2505_s5 + $0x8] sm:$0xff]   ;;  %v2268_v47 = vpop.permute.xlu0 %447 }
 0x29b   :  { %v249_v49 = vpack.c.bf16 %v2080_v48, %v2080_v48  ;;  %vm449_vm3 = vcmp.eq.s32.totalorder %v2268_v47, 1  ;;  %v1793_v47 = vld [vmem:[%s2507_s6 + $0x10] sm:$0xff]  }
 0x29d   :  { %1471 = vmatmul.mubr.bf16.vlgmr.msra.gmra.mxu1 %v249_v49 }
 0x29e   :  { %1495 = vmatpush3.bf16.msra.mxu1 %v1885_v1  ;;  %1510 = vmatprep.mubr.msk.bf16.mxu1 %vm1833_vm0, %v1832_v0 }
 0x29f   :  { %1496 = vmatprep.subr.bf16.mxu1 %v1832_v0 }
 0x2a2   :  { %1497 = vmatpush3.bf16.msra.mxu1 %v1895_v3 }
 0x2a3   :  { %1498 = vmatprep.subr.bf16.mxu1 %v1832_v0 }
 0x2a6   :  { %1499 = vmatpush3.bf16.msra.mxu1 %v1907_v4 }
 0x2a7   :  { %1500 = vmatprep.subr.bf16.mxu1 %v1832_v0 }
 0x2aa   :  { %1501 = vmatpush3.bf16.msra.mxu1 %v1923_v6 }
 0x2ab   :  { %1502 = vmatprep.subr.bf16.mxu1 %v1832_v0 }
 0x2ae   :  { %1503 = vmatpush3.bf16.msra.mxu1 %v1935_v9 }
 0x2af   :  { %1504 = vmatprep.subr.bf16.mxu1 %v1832_v0 }
 0x2b2   :  { %1505 = vmatpush3.bf16.msra.mxu1 %v1946_v11 }
 0x2b3   :  { %1506 = vmatprep.subr.bf16.mxu1 %v1832_v0 }
 0x2b6   :  { %1507 = vmatpush3.bf16.msra.mxu1 %v1956_v13 }
 0x2b7   :  { %1508 = vmatprep.subr.bf16.mxu1 %v1832_v0 }
 0x2ba   :  { %1509 = vmatpush3.bf16.msra.mxu1 %v1965_v14 }
 0x2bb   :  { %1534 = vmatprep.subr.bf16.mxu1 %v1832_v0 }
 0x35d   :  { %v284_v51 = vpop.f32.mrf.mxu1 }
 0x35e   :  { %v290_v52 = vadd.f32 %v284_v51, %v248_v50 }
 0x35f   :  { %v1472_v53 = vpop.f32.mrf.mxu1 }
 0x360   :  { %1802 = vtanh.f32 %v290_v52 }
 0x361   :  { %v287_v54 = vpop.f32.mrf.mxu1 }
 0x363   :  { %v1473_v55 = vpop.f32.mrf.mxu1 }
 0x36d   :  { %v1803_v57 = vpop.eup %1802 }
 0x36e   :  { %v2111_v58 = vsel %vm296_vm13, %v1803_v57, %v2080_v48  ;;  %v2314_v57 = vpop.permute.xlu1 %498 }
 0x36f   :  { %v300_v59 = vpack.c.bf16 %v2111_v58, %v2111_v58  ;;  %v503_v29 = vpack.c.bf16 %v2111_v58, %v2080_v48  ;;  %vm500_vm4 = vcmp.eq.s32.totalorder %v2314_v57, 1 }
 0x371   :  { %1491 = vmatmul.mubr.bf16.vlgmr.msra.gmra.mxu0 %v300_v59 }
 0x372   :  { %1515 = vmatpush3.bf16.msra.mxu0 %v1885_v1  ;;  %1530 = vmatprep.mubr.msk.bf16.mxu0 %vm1833_vm0, %v1832_v0 }
 0x373   :  { %1516 = vmatprep.subr.bf16.mxu0 %v1832_v0 }
 0x376   :  { %1517 = vmatpush3.bf16.msra.mxu0 %v1895_v3 }
 0x377   :  { %1518 = vmatprep.subr.bf16.mxu0 %v1832_v0 }
 0x37a   :  { %1519 = vmatpush3.bf16.msra.mxu0 %v1907_v4 }
 0x37b   :  { %1520 = vmatprep.subr.bf16.mxu0 %v1832_v0 }
 0x37e   :  { %1521 = vmatpush3.bf16.msra.mxu0 %v1923_v6 }
 0x37f   :  { %1522 = vmatprep.subr.bf16.mxu0 %v1832_v0 }
 0x382   :  { %1523 = vmatpush3.bf16.msra.mxu0 %v1935_v9 }
 0x383   :  { %1524 = vmatprep.subr.bf16.mxu0 %v1832_v0 }
 0x386   :  { %1525 = vmatpush3.bf16.msra.mxu0 %v1946_v11 }
 0x387   :  { %1526 = vmatprep.subr.bf16.mxu0 %v1832_v0 }
 0x38a   :  { %1527 = vmatpush3.bf16.msra.mxu0 %v1956_v13 }
 0x38b   :  { %1528 = vmatprep.subr.bf16.mxu0 %v1832_v0 }
 0x38e   :  { %1529 = vmatpush3.bf16.msra.mxu0 %v1965_v14 }
 0x431   :  { %v335_v61 = vpop.f32.mrf.mxu0 }
 0x432   :  { %v341_v62 = vadd.f32 %v335_v61, %v299_v60 }
 0x433   :  { %v1492_v63 = vpop.f32.mrf.mxu0 }
 0x434   :  { %1804 = vtanh.f32 %v341_v62  ;;  %v2326_v63 = vld [vmem:[%s2506_s4] ss:$0 sm:$0xff] }
 0x435   :  { %v338_v5 = vpop.f32.mrf.mxu0 }
 0x437   :  { %v1493_v7 = vpop.f32.mrf.mxu0 }
 0x441   :  { %v1805_v10 = vpop.eup %1804 }
 0x442   :  { %v2141_v12 = vsel %vm347_vm14, %v1805_v10, %v2111_v58 }
 0x443   :  { %v351_v15 = vpack.c.bf16 %v2141_v12, %v2141_v12 }
 0x445   :  { %1511 = vmatmul.mubr.bf16.vlgmr.msra.gmra.mxu1 %v351_v15 }
 0x446   :  { %1535 = vmatpush3.bf16.msra.mxu1 %v1885_v1  ;;  %1550 = vmatprep.mubr.msk.bf16.mxu1 %vm1833_vm0, %v1832_v0  ;;  %v1772_v1 = vld [vmem:[%s2504_s3 + $0x38] sm:$0xff]  }
 0x447   :  { %1536 = vmatprep.subr.bf16.mxu1 %v1832_v0  ;;  %1554 = vmatprep.subr.bf16.mxu0 %v1772_v1 }
 0x44a   :  { %1537 = vmatpush3.bf16.msra.mxu1 %v1895_v3  ;;  %v350_v3 = vld [vmem:[%s2503_s1 + $0x28] sm:$0xff] }
 0x44b   :  { %1538 = vmatprep.subr.bf16.mxu1 %v1832_v0 }
 0x44e   :  { %1539 = vmatpush3.bf16.msra.mxu1 %v1907_v4 }
 0x44f   :  { %1540 = vmatprep.subr.bf16.mxu1 %v1832_v0 }
 0x452   :  { %1541 = vmatpush3.bf16.msra.mxu1 %v1923_v6 }
 0x453   :  { %1542 = vmatprep.subr.bf16.mxu1 %v1832_v0 }
 0x456   :  { %1543 = vmatpush3.bf16.msra.mxu1 %v1935_v9 }
 0x457   :  { %1544 = vmatprep.subr.bf16.mxu1 %v1832_v0 }
 0x45a   :  { %1545 = vmatpush3.bf16.msra.mxu1 %v1946_v11 }
 0x45b   :  { %1546 = vmatprep.subr.bf16.mxu1 %v1832_v0 }
 0x45e   :  { %1547 = vmatpush3.bf16.msra.mxu1 %v1956_v13 }
 0x45f   :  { %1548 = vmatprep.subr.bf16.mxu1 %v1832_v0 }
 0x462   :  { %1549 = vmatpush3.bf16.msra.mxu1 %v1965_v14 }
 0x463   :  { %1578 = vmatprep.subr.bf16.mxu1 %v1832_v0 }
 0x505   :  { %v386_v4 = vpop.f32.mrf.mxu1 }
 0x506   :  { %v392_v6 = vadd.f32 %v386_v4, %v350_v3 }
 0x507   :  { %v1512_v9 = vpop.f32.mrf.mxu1 }
 0x508   :  { %1806 = vtanh.f32 %v392_v6 }
 0x509   :  { %v389_v11 = vpop.f32.mrf.mxu1 }
 0x50b   :  { %v1513_v13 = vpop.f32.mrf.mxu1 }
 0x515   :  { %v1807_v14 = vpop.eup %1806 }
 0x516   :  { %v2175_v17 = vsel %vm398_vm15, %v1807_v14, %v2141_v12 }
 0x517   :  { %v402_v18 = vpack.c.bf16 %v2175_v17, %v2175_v17  ;;  %v504_v30 = vpack.c.bf16 %v2175_v17, %v2141_v12 }
 0x519   :  { %1531 = vmatmul.mubr.bf16.vlgmr.msra.gmra.mxu0 %v402_v18 }
 0x51a   :  { %1555 = vmatpush3.bf16.msra.mxu0 %v1772_v1  ;;  %1570 = vmatprep.mubr.msk.bf16.mxu0 %vm1206_vm2, %v1207_v20 }
 0x51b   :  { %1556 = vmatprep.subr.bf16.mxu0 %v1773_v19 }
 0x51e   :  { %1557 = vmatpush3.bf16.msra.mxu0 %v1773_v19 }
 0x51f   :  { %1558 = vmatprep.subr.bf16.mxu0 %v1774_v24 }
 0x522   :  { %1559 = vmatpush3.bf16.msra.mxu0 %v1774_v24 }
 0x523   :  { %1560 = vmatprep.subr.bf16.mxu0 %v1775_v25 }
 0x526   :  { %1561 = vmatpush3.bf16.msra.mxu0 %v1775_v25 }
 0x527   :  { %1562 = vmatprep.subr.bf16.mxu0 %v1776_v22 }
 0x52a   :  { %1563 = vmatpush3.bf16.msra.mxu0 %v1776_v22 }
 0x52b   :  { %1564 = vmatprep.subr.bf16.mxu0 %v1777_v26 }
 0x52e   :  { %1565 = vmatpush3.bf16.msra.mxu0 %v1777_v26 }
 0x52f   :  { %1566 = vmatprep.subr.bf16.mxu0 %v1778_v27 }
 0x532   :  { %1567 = vmatpush3.bf16.msra.mxu0 %v1778_v27 }
 0x533   :  { %1568 = vmatprep.subr.bf16.mxu0 %v1779_v28 }
 0x536   :  { %1569 = vmatpush3.bf16.msra.mxu0 %v1779_v28 }
 0x537   :  { %1598 = vmatprep.subr.bf16.mxu0 %v1832_v0 }
 0x539   :  { %1571 = vmatmul.mubr.bf16.vlgmr.msra.gmra.mxu0 %v503_v29 }
 0x53a   :  { %1574 = vmatprep.mubr.bf16.mxu0 %v504_v30  ;;  %1599 = vmatpush3.bf16.msra.mxu0 %v2212_v31 }
 0x53b   :  { %1600 = vmatprep.subr.bf16.mxu0 %v1832_v0 }
 0x53e   :  { %1601 = vmatpush3.bf16.msra.mxu0 %v2218_v32 }
 0x53f   :  { %1602 = vmatprep.subr.bf16.mxu0 %v1832_v0 }
 0x542   :  { %1603 = vmatpush3.bf16.msra.mxu0 %v2226_v33 }
 0x543   :  { %1604 = vmatprep.subr.bf16.mxu0 %v1832_v0 }
 0x546   :  { %1605 = vmatpush3.bf16.msra.mxu0 %v2233_v34 }
 0x547   :  { %1606 = vmatprep.subr.bf16.mxu0 %v1832_v0 }
 0x54a   :  { %1607 = vmatpush3.bf16.msra.mxu0 %v2240_v36 }
 0x54b   :  { %1608 = vmatprep.subr.bf16.mxu0 %v1832_v0 }
 0x54e   :  { %1609 = vmatpush3.bf16.msra.mxu0 %v2247_v37 }
 0x54f   :  { %1610 = vmatprep.subr.bf16.mxu0 %v1832_v0 }
 0x552   :  { %1611 = vmatpush3.bf16.msra.mxu0 %v2254_v38 }
 0x553   :  { %1612 = vmatprep.subr.bf16.mxu0 %v1832_v0 }
 0x556   :  { %1613 = vmatpush3.bf16.msra.mxu0 %v2261_v39 }
 0x557   :  { %1638 = vmatprep.subr.bf16.mxu0 %v1832_v0 }
 0x5d9   :  { %v437_v41 = vpop.f32.mrf.mxu0 }
 0x5da   :  { %v443_v42 = vadd.f32 %v437_v41, %v401_v40 }
 0x5db   :  { %v1532_v43 = vpop.f32.mrf.mxu0 }
 0x5dc   :  { %1808 = vtanh.f32 %v443_v42 }
 0x5dd   :  { %v440_v44 = vpop.f32.mrf.mxu0 }
 0x5df   :  { %v1533_v45 = vpop.f32.mrf.mxu0 }
 0x5e9   :  { %v1809_v48 = vpop.eup %1808 }
 0x5ea   :  { %v450_v49 = vsel %vm449_vm3, %v1809_v48, %v2175_v17 }
 0x5eb   :  { %v453_v50 = vpack.c.bf16 %v450_v49, %v450_v49 }
 0x5ed   :  { %1551 = vmatmul.mubr.bf16.vlgmr.msra.gmra.mxu1 %v453_v50 }
 0x5ee   :  { %1579 = vmatpush3.bf16.msra.mxu1 %v2212_v31  ;;  %1594 = vmatprep.mubr.msk.bf16.mxu1 %vm1833_vm0, %v1832_v0 }
 0x5ef   :  { %1580 = vmatprep.subr.bf16.mxu1 %v1832_v0 }
 0x5f2   :  { %1581 = vmatpush3.bf16.msra.mxu1 %v2218_v32 }
 0x5f3   :  { %1582 = vmatprep.subr.bf16.mxu1 %v1832_v0 }
 0x5f6   :  { %1583 = vmatpush3.bf16.msra.mxu1 %v2226_v33 }
 0x5f7   :  { %1584 = vmatprep.subr.bf16.mxu1 %v1832_v0 }
 0x5f9   :  { %v2321_v61 = vpop.f32.mrf.mxu0 }
 0x5fa   :  { %1585 = vmatpush3.bf16.msra.mxu1 %v2233_v34  ;;  %v620_v21 = vadd.f32 %v2321_v61, %v2326_v63 }
 0x5fb   :  { %1586 = vmatprep.subr.bf16.mxu1 %v1832_v0  ;;  %v611_v62 = vpop.f32.mrf.mxu0 }
 0x5fc   :  { %v612_v5 = vadd.f32 %v2326_v63, %v611_v62 }
 0x5fd   :  { %v2349_v23 = vpop.f32.mrf.mxu0 }
 0x5fe   :  { %1587 = vmatpush3.bf16.msra.mxu1 %v2240_v36  ;;  %v623_v46 = vadd.f32 %v2349_v23, %v2326_v63 }
 0x5ff   :  { %1588 = vmatprep.subr.bf16.mxu1 %v1832_v0  ;;  %v614_v6 = vpop.f32.mrf.mxu0 }
 0x600   :  { %v615_v17 = vadd.f32 %v2326_v63, %v614_v6 }
 0x602   :  { %1589 = vmatpush3.bf16.msra.mxu1 %v2247_v37 }
 0x603   :  { %1590 = vmatprep.subr.bf16.mxu1 %v1832_v0 }
 0x606   :  { %1591 = vmatpush3.bf16.msra.mxu1 %v2254_v38 }
 0x607   :  { %1592 = vmatprep.subr.bf16.mxu1 %v1832_v0 }
 0x60a   :  { %1593 = vmatpush3.bf16.msra.mxu1 %v2261_v39 }
 0x60b   :  { %1618 = vmatprep.subr.bf16.mxu1 %v1832_v0 }
 0x60d   :  { %1595 = vmatmul.mubr.bf16.vlgmr.msra.gmra.mxu1 %v1834_v2  ;;  %v452_v2 = vld [vmem:[%s2503_s1 + $0x38] sm:$0xff] }
 0x60e   :  { %1619 = vmatpush3.bf16.msra.mxu1 %v2212_v31  ;;  %1634 = vmatprep.mubr.msk.bf16.mxu1 %vm1833_vm0, %v1832_v0 }
 0x60f   :  { %1620 = vmatprep.subr.bf16.mxu1 %v1832_v0 }
 0x612   :  { %1621 = vmatpush3.bf16.msra.mxu1 %v2218_v32 }
 0x613   :  { %1622 = vmatprep.subr.bf16.mxu1 %v1832_v0 }
 0x616   :  { %1623 = vmatpush3.bf16.msra.mxu1 %v2226_v33 }
 0x617   :  { %1624 = vmatprep.subr.bf16.mxu1 %v1832_v0 }
 0x61a   :  { %1625 = vmatpush3.bf16.msra.mxu1 %v2233_v34 }
 0x61b   :  { %1626 = vmatprep.subr.bf16.mxu1 %v1832_v0 }
 0x61e   :  { %1627 = vmatpush3.bf16.msra.mxu1 %v2240_v36 }
 0x61f   :  { %1628 = vmatprep.subr.bf16.mxu1 %v1832_v0 }
 0x622   :  { %1629 = vmatpush3.bf16.msra.mxu1 %v2247_v37 }
 0x623   :  { %1630 = vmatprep.subr.bf16.mxu1 %v1832_v0 }
 0x626   :  { %1631 = vmatpush3.bf16.msra.mxu1 %v2254_v38 }
 0x627   :  { %1632 = vmatprep.subr.bf16.mxu1 %v1832_v0 }
 0x62a   :  { %1633 = vmatpush3.bf16.msra.mxu1 %v2261_v39 }
 0x62b   :  { %1658 = vmatprep.subr.bf16.mxu1 %v1832_v0 }
 0x6ad   :  { %v488_v51 = vpop.f32.mrf.mxu1 }
 0x6ae   :  { %v494_v52 = vadd.f32 %v488_v51, %v452_v2 }
 0x6af   :  { %v1552_v53 = vpop.f32.mrf.mxu1 }
 0x6b0   :  { %1810 = vtanh.f32 %v494_v52 }
 0x6b1   :  { %v491_v54 = vpop.f32.mrf.mxu1 }
 0x6b3   :  { %v1553_v55 = vpop.f32.mrf.mxu1 }
 0x6bd   :  { %v1811_v58 = vpop.eup %1810 }
 0x6be   :  { %v501_v59 = vsel %vm500_vm4, %v1811_v58, %v450_v49 }
 0x6bf   :  { %v505_v60 = vpack.c.bf16 %v501_v59, %v450_v49 }
 0x6c1   :  { %1575 = vmatmul.mubr.bf16.gmra.mxu0 %v505_v60 }
 0x6c2   :  { %1614 = vmatprep.mubr.msk.bf16.mxu0 %vm1833_vm0, %v1832_v0 }
 0x6cd   :  { %v740_v7 = vpop.f32.mrf.mxu1 }
 0x6ce   :  { %v746_v10 = vadd.f32 %v740_v7, %v612_v5 }
 0x6cf   :  { %v1596_v12 = vpop.f32.mrf.mxu1 }
 0x6d0   :  { %1812 = vtanh.f32 %v746_v10 }
 0x6d1   :  { %v743_v15 = vpop.f32.mrf.mxu1 }
 0x6d3   :  { %v1597_v1 = vpop.f32.mrf.mxu1 }
 0x6dd   :  { %v1813_v3 = vpop.eup %1812 }
 0x6de   :  { %v1218_v4 = vpack.c.bf16 %v1813_v3, %v1813_v3  ;;  %v748_v26 = vsel %vm143_vm5, %v1813_v3, 0.0 }
 0x6e0   :  { %1615 = vmatmul.mubr.msk.bf16.vlgmr.msra.gmra.mxu0 %vm2004_vm6, %v1218_v4 }
 0x6e1   :  { %1639 = vmatpush3.bf16.msra.mxu0 %v2212_v31  ;;  %1654 = vmatprep.mubr.msk.bf16.mxu0 %vm1833_vm0, %v1832_v0 }
 0x6e2   :  { %1640 = vmatprep.subr.bf16.mxu0 %v1832_v0 }
 0x6e5   :  { %1641 = vmatpush3.bf16.msra.mxu0 %v2218_v32 }
 0x6e6   :  { %1642 = vmatprep.subr.bf16.mxu0 %v1832_v0 }
 0x6e9   :  { %1643 = vmatpush3.bf16.msra.mxu0 %v2226_v33 }
 0x6ea   :  { %1644 = vmatprep.subr.bf16.mxu0 %v1832_v0 }
 0x6ed   :  { %1645 = vmatpush3.bf16.msra.mxu0 %v2233_v34 }
 0x6ee   :  { %1646 = vmatprep.subr.bf16.mxu0 %v1832_v0 }
 0x6f1   :  { %1647 = vmatpush3.bf16.msra.mxu0 %v2240_v36 }
 0x6f2   :  { %1648 = vmatprep.subr.bf16.mxu0 %v1832_v0 }
 0x6f5   :  { %1649 = vmatpush3.bf16.msra.mxu0 %v2247_v37 }
 0x6f6   :  { %1650 = vmatprep.subr.bf16.mxu0 %v1832_v0 }
 0x6f9   :  { %1651 = vmatpush3.bf16.msra.mxu0 %v2254_v38 }
 0x6fa   :  { %1652 = vmatprep.subr.bf16.mxu0 %v1832_v0 }
 0x6fd   :  { %1653 = vmatpush3.bf16.msra.mxu0 %v2261_v39 }
 0x6fe   :  { %1678 = vmatprep.subr.bf16.mxu0 %v1832_v0 }
 0x781   :  { %v2351_v9 = vpop.f32.mrf.mxu0 }
 0x782   :  { %v636_v12 = vadd.f32 %v2351_v9, %v2326_v63  ;;  %v1792_v9 = vld [vmem:[%s2507_s6 + $0x18] sm:$0xff]  }
 0x783   :  { %v2353_v11 = vpop.f32.mrf.mxu0 }
 0x784   :  { %v628_v56 = vadd.f32 %v2326_v63, %v2353_v11 }
 0x785   :  { %v2355_v13 = vpop.f32.mrf.mxu0 }
 0x787   :  { %v2357_v14 = vpop.f32.mrf.mxu0 }
 0x788   :  { %v631_v8 = vadd.f32 %v2326_v63, %v2357_v14 }
 0x7a0   :  { %v784_v18 = vpop.f32.mrf.mxu0 }
 0x7a1   :  { %v790_v19 = vadd.f32 %v784_v18, %v615_v17  ;;  %v1791_v17 = vld [vmem:[%s2507_s6 + $0x20] sm:$0xff]   ;;  %v1794_v18 = vld [vmem:[%s2507_s6 + $0x8] sm:$0xff]  }
 0x7a2   :  { %v1616_v20 = vpop.f32.mrf.mxu0 }
 0x7a3   :  { %1814 = vtanh.f32 %v790_v19  ;;  %v1795_v19 = vld [vmem:[%s2507_s6] sm:$0xff]   ;;  %v639_v20 = vadd.f32 %v2355_v13, %v2326_v63 }
 0x7a4   :  { %v787_v24 = vpop.f32.mrf.mxu0 }
 0x7a6   :  { %v1617_v25 = vpop.f32.mrf.mxu0 }
 0x7b0   :  { %v1815_v22 = vpop.eup %1814 }
 0x7b1   :  { %v792_v27 = vsel %vm194_vm11, %v1815_v22, %v748_v26 }
 0x7b2   :  { %v793_v28 = vpack.c.bf16 %v792_v27, %v792_v27 }
 0x7b4   :  { %1635 = vmatmul.mubr.bf16.vlgmr.msra.gmra.mxu1 %v793_v28 }
 0x7b5   :  { %1659 = vmatpush3.bf16.msra.mxu1 %v2212_v31  ;;  %1674 = vmatprep.mubr.msk.bf16.mxu1 %vm1833_vm0, %v1832_v0 }
 0x7b6   :  { %1660 = vmatprep.subr.bf16.mxu1 %v1832_v0 }
 0x7b9   :  { %1661 = vmatpush3.bf16.msra.mxu1 %v2218_v32 }
 0x7ba   :  { %1662 = vmatprep.subr.bf16.mxu1 %v1832_v0 }
 0x7bd   :  { %1663 = vmatpush3.bf16.msra.mxu1 %v2226_v33 }
 0x7be   :  { %1664 = vmatprep.subr.bf16.mxu1 %v1832_v0 }
 0x7c1   :  { %1665 = vmatpush3.bf16.msra.mxu1 %v2233_v34 }
 0x7c2   :  { %1666 = vmatprep.subr.bf16.mxu1 %v1832_v0 }
 0x7c5   :  { %1667 = vmatpush3.bf16.msra.mxu1 %v2240_v36 }
 0x7c6   :  { %1668 = vmatprep.subr.bf16.mxu1 %v1832_v0 }
 0x7c9   :  { %1669 = vmatpush3.bf16.msra.mxu1 %v2247_v37 }
 0x7ca   :  { %1670 = vmatprep.subr.bf16.mxu1 %v1832_v0 }
 0x7cd   :  { %1671 = vmatpush3.bf16.msra.mxu1 %v2254_v38 }
 0x7ce   :  { %1672 = vmatprep.subr.bf16.mxu1 %v1832_v0 }
 0x7d1   :  { %1673 = vmatpush3.bf16.msra.mxu1 %v2261_v39 }
 0x7d2   :  { %1698 = vmatprep.subr.bf16.mxu1 %v1832_v0 }
 0x874   :  { %v828_v35 = vpop.f32.mrf.mxu1 }
 0x875   :  { %v834_v29 = vadd.f32 %v828_v35, %v620_v21 }
 0x876   :  { %v1636_v30 = vpop.f32.mrf.mxu1 }
 0x877   :  { %1816 = vtanh.f32 %v834_v29 }
 0x878   :  { %v831_v40 = vpop.f32.mrf.mxu1 }
 0x87a   :  { %v1637_v41 = vpop.f32.mrf.mxu1 }
 0x884   :  { %v1817_v42 = vpop.eup %1816 }
 0x885   :  { %v836_v43 = vsel %vm245_vm12, %v1817_v42, %v792_v27 }
 0x886   :  { %v837_v44 = vpack.c.bf16 %v836_v43, %v836_v43 }
 0x888   :  { %1655 = vmatmul.mubr.bf16.vlgmr.msra.gmra.mxu0 %v837_v44 }
 0x889   :  { %1679 = vmatpush3.bf16.msra.mxu0 %v2212_v31  ;;  %1694 = vmatprep.mubr.msk.bf16.mxu0 %vm1833_vm0, %v1832_v0 }
 0x88a   :  { %1680 = vmatprep.subr.bf16.mxu0 %v1832_v0 }
 0x88d   :  { %1681 = vmatpush3.bf16.msra.mxu0 %v2218_v32 }
 0x88e   :  { %1682 = vmatprep.subr.bf16.mxu0 %v1832_v0 }
 0x891   :  { %1683 = vmatpush3.bf16.msra.mxu0 %v2226_v33 }
 0x892   :  { %1684 = vmatprep.subr.bf16.mxu0 %v1832_v0 }
 0x895   :  { %1685 = vmatpush3.bf16.msra.mxu0 %v2233_v34 }
 0x896   :  { %1686 = vmatprep.subr.bf16.mxu0 %v1832_v0 }
 0x899   :  { %1687 = vmatpush3.bf16.msra.mxu0 %v2240_v36 }
 0x89a   :  { %1688 = vmatprep.subr.bf16.mxu0 %v1832_v0 }
 0x89d   :  { %1689 = vmatpush3.bf16.msra.mxu0 %v2247_v37 }
 0x89e   :  { %1690 = vmatprep.subr.bf16.mxu0 %v1832_v0 }
 0x8a1   :  { %1691 = vmatpush3.bf16.msra.mxu0 %v2254_v38 }
 0x8a2   :  { %1692 = vmatprep.subr.bf16.mxu0 %v1832_v0 }
 0x8a5   :  { %1693 = vmatpush3.bf16.msra.mxu0 %v2261_v39 }
 0x8a6   :  { %1718 = vmatprep.subr.bf16.mxu0 %v1832_v0 }
 0x948   :  { %v872_v45 = vpop.f32.mrf.mxu0 }
 0x949   :  { %v878_v48 = vadd.f32 %v872_v45, %v623_v46 }
 0x94a   :  { %v1656_v49 = vpop.f32.mrf.mxu0 }
 0x94b   :  { %1818 = vtanh.f32 %v878_v48 }
 0x94c   :  { %v875_v50 = vpop.f32.mrf.mxu0 }
 0x94e   :  { %v1657_v2 = vpop.f32.mrf.mxu0 }
 0x958   :  { %v1819_v51 = vpop.eup %1818 }
 0x959   :  { %v880_v52 = vsel %vm296_vm13, %v1819_v51, %v836_v43 }
 0x95a   :  { %v881_v53 = vpack.c.bf16 %v880_v52, %v880_v52 }
 0x95c   :  { %1675 = vmatmul.mubr.bf16.vlgmr.msra.gmra.mxu1 %v881_v53 }
 0x95d   :  { %1699 = vmatpush3.bf16.msra.mxu1 %v2212_v31  ;;  %1714 = vmatprep.mubr.msk.bf16.mxu1 %vm1833_vm0, %v1832_v0 }
 0x95e   :  { %1700 = vmatprep.subr.bf16.mxu1 %v1832_v0 }
 0x961   :  { %1701 = vmatpush3.bf16.msra.mxu1 %v2218_v32 }
 0x962   :  { %1702 = vmatprep.subr.bf16.mxu1 %v1832_v0 }
 0x965   :  { %1703 = vmatpush3.bf16.msra.mxu1 %v2226_v33 }
 0x966   :  { %1704 = vmatprep.subr.bf16.mxu1 %v1832_v0 }
 0x969   :  { %1705 = vmatpush3.bf16.msra.mxu1 %v2233_v34 }
 0x96a   :  { %1706 = vmatprep.subr.bf16.mxu1 %v1832_v0 }
 0x96d   :  { %1707 = vmatpush3.bf16.msra.mxu1 %v2240_v36 }
 0x96e   :  { %1708 = vmatprep.subr.bf16.mxu1 %v1832_v0 }
 0x971   :  { %1709 = vmatpush3.bf16.msra.mxu1 %v2247_v37 }
 0x972   :  { %1710 = vmatprep.subr.bf16.mxu1 %v1832_v0 }
 0x975   :  { %1711 = vmatpush3.bf16.msra.mxu1 %v2254_v38 }
 0x976   :  { %1712 = vmatprep.subr.bf16.mxu1 %v1832_v0 }
 0x979   :  { %1713 = vmatpush3.bf16.msra.mxu1 %v2261_v39 }
 0x97a   :  { %1738 = vmatprep.subr.bf16.mxu1 %v1832_v0 }
 0xa1c   :  { %v916_v54 = vpop.f32.mrf.mxu1 }
 0xa1d   :  { %v922_v55 = vadd.f32 %v916_v54, %v628_v56 }
 0xa1e   :  { %v1676_v58 = vpop.f32.mrf.mxu1 }
 0xa1f   :  { %1820 = vtanh.f32 %v922_v55 }
 0xa20   :  { %v919_v59 = vpop.f32.mrf.mxu1 }
 0xa22   :  { %v1677_v60 = vpop.f32.mrf.mxu1 }
 0xa2c   :  { %v1821_v61 = vpop.eup %1820 }
 0xa2d   :  { %v924_v62 = vsel %vm347_vm14, %v1821_v61, %v880_v52 }
 0xa2e   :  { %v925_v5 = vpack.c.bf16 %v924_v62, %v924_v62 }
 0xa30   :  { %1695 = vmatmul.mubr.bf16.vlgmr.msra.gmra.mxu0 %v925_v5 }
 0xa31   :  { %1719 = vmatpush3.bf16.msra.mxu0 %v2212_v31  ;;  %1734 = vmatprep.mubr.msk.bf16.mxu0 %vm1833_vm0, %v1832_v0 }
 0xa32   :  { %1720 = vmatprep.subr.bf16.mxu0 %v1832_v0 }
 0xa35   :  { %1721 = vmatpush3.bf16.msra.mxu0 %v2218_v32 }
 0xa36   :  { %1722 = vmatprep.subr.bf16.mxu0 %v1832_v0 }
 0xa39   :  { %1723 = vmatpush3.bf16.msra.mxu0 %v2226_v33 }
 0xa3a   :  { %1724 = vmatprep.subr.bf16.mxu0 %v1832_v0 }
 0xa3d   :  { %1725 = vmatpush3.bf16.msra.mxu0 %v2233_v34 }
 0xa3e   :  { %1726 = vmatprep.subr.bf16.mxu0 %v1832_v0 }
 0xa41   :  { %1727 = vmatpush3.bf16.msra.mxu0 %v2240_v36 }
 0xa42   :  { %1728 = vmatprep.subr.bf16.mxu0 %v1832_v0 }
 0xa45   :  { %1729 = vmatpush3.bf16.msra.mxu0 %v2247_v37 }
 0xa46   :  { %1730 = vmatprep.subr.bf16.mxu0 %v1832_v0 }
 0xa49   :  { %1731 = vmatpush3.bf16.msra.mxu0 %v2254_v38  ;;  %v1788_v38 = vld [vmem:[%s2507_s6 + $0x38] sm:$0xff]  }
 0xa4a   :  { %1732 = vmatprep.subr.bf16.mxu0 %v1832_v0 }
 0xa4d   :  { %1733 = vmatpush3.bf16.msra.mxu0 %v2261_v39  ;;  %v1789_v39 = vld [vmem:[%s2507_s6 + $0x30] sm:$0xff]  }
 0xaf0   :  { %v960_v31 = vpop.f32.mrf.mxu0 }
 0xaf1   :  { %v966_v32 = vadd.f32 %v960_v31, %v631_v8 }
 0xaf2   :  { %v1696_v33 = vpop.f32.mrf.mxu0 }
 0xaf3   :  { %1822 = vtanh.f32 %v966_v32 }
 0xaf4   :  { %v963_v34 = vpop.f32.mrf.mxu0 }
 0xaf6   :  { %v1697_v36 = vpop.f32.mrf.mxu0 }
 0xb00   :  { %v1823_v7 = vpop.eup %1822 }
 0xb01   :  { %v968_v37 = vsel %vm398_vm15, %v1823_v7, %v924_v62 }
 0xb02   :  { %v969_v10 = vpack.c.bf16 %v968_v37, %v968_v37 }
 0xb04   :  { %1715 = vmatmul.mubr.bf16.vlgmr.msra.gmra.mxu1 %v969_v10 }
 0xb05   :  { %1754 = vmatprep.mubr.msk.bf16.mxu1 %vm1833_vm0, %v1832_v0  ;;  %1739 = vmatpush3.bf16.msra.mxu1 %v1788_v38  ;;  %vm1169_vm0 = vcmask 31744  }
 0xb06   :  { %1740 = vmatprep.subr.bf16.mxu1 %v1832_v0 }
 0xb09   :  { %1741 = vmatpush3.bf16.msra.mxu1 %v1789_v39 }
 0xb0a   :  { %1742 = vmatprep.subr.bf16.mxu1 %v1832_v0 }
 0xb0d   :  { %1743 = vmatpush3.bf16.msra.mxu1 %v1790_v16 }
 0xb0e   :  { %1744 = vmatprep.subr.bf16.mxu1 %v1832_v0 }
 0xb11   :  { %1745 = vmatpush3.bf16.msra.mxu1 %v1791_v17 }
 0xb12   :  { %1746 = vmatprep.subr.bf16.mxu1 %v1832_v0 }
 0xb15   :  { %1747 = vmatpush3.bf16.msra.mxu1 %v1792_v9 }
 0xb16   :  { %1748 = vmatprep.subr.bf16.mxu1 %v1832_v0 }
 0xb19   :  { %1749 = vmatpush3.bf16.msra.mxu1 %v1793_v47 }
 0xb1a   :  { %1750 = vmatprep.subr.bf16.mxu1 %v1832_v0 }
 0xb1d   :  { %1751 = vmatpush3.bf16.msra.mxu1 %v1794_v18 }
 0xb1e   :  { %1752 = vmatprep.subr.bf16.mxu1 %v1832_v0  ;;  %v1220_v0 = vld [vmem:[%s2508_s7] ss:$0 sm:$0xff] }
 0xb21   :  { %1753 = vmatpush3.bf16.msra.mxu1 %v1795_v19 }
 0xbc4   :  { %v1004_v15 = vpop.f32.mrf.mxu1 }
 0xbc5   :  { %v1010_v1 = vadd.f32 %v1004_v15, %v636_v12 }
 0xbc6   :  { %v1716_v3 = vpop.f32.mrf.mxu1 }
 0xbc7   :  { %1824 = vtanh.f32 %v1010_v1 }
 0xbc8   :  { %v1007_v4 = vpop.f32.mrf.mxu1 }
 0xbca   :  { %v1717_v23 = vpop.f32.mrf.mxu1 }
 0xbd4   :  { %v1825_v6 = vpop.eup %1824 }
 0xbd5   :  { %v1012_v11 = vsel %vm449_vm3, %v1825_v6, %v968_v37 }
 0xbd6   :  { %v1013_v14 = vpack.c.bf16 %v1012_v11, %v1012_v11 }
 0xbd8   :  { %1735 = vmatmul.mubr.bf16.vlgmr.msra.gmra.mxu0 %v1013_v14 }
 0xc98   :  { %v1048_v24 = vpop.f32.mrf.mxu0 }
 0xc99   :  { %v1054_v25 = vadd.f32 %v1048_v24, %v639_v20 }
 0xc9a   :  { %v1736_v22 = vpop.f32.mrf.mxu0 }
 0xc9b   :  { %1826 = vtanh.f32 %v1054_v25 }
 0xc9c   :  { %v1051_v26 = vpop.f32.mrf.mxu0 }
 0xc9e   :  { %v1737_v27 = vpop.f32.mrf.mxu0 }
 0xca8   :  { %v1827_v28 = vpop.eup %1826 }
 0xca9   :  { %v1056_v21 = vsel %vm500_vm4, %v1827_v28, %v1012_v11 }
 0xcaa   :  { %v1057_v35 = vpack.c.bf16 %v1056_v21, %v1056_v21 }
 0xcac   :  { %1755 = vmatmul.mubr.bf16.vlgmr.msra.gmra.mxu1 %v1057_v35 }
 0xd6c   :  { %v1163_v29 = vpop.f32.mrf.mxu1 }
 0xd6d   :  { %v1164_v30 = vadd.f32 %v1220_v0, %v1163_v29 }
 0xd6e   :  { %v1756_v63 = vpop.f32.mrf.mxu1 }
 0xd6f   :  { %v1170_v13 = vsel %vm1169_vm0, %v1164_v30, -inf }
 0xd70   :  { %1171 = vmax.xlane.f32.xlu0 %v1170_v13  ;;  %v1166_v40 = vpop.f32.mrf.mxu1 }
 0xd72   :  { %v1757_v41 = vpop.f32.mrf.mxu1 }
 0xdf9   :  { %v1172_v42 = vpop.xlane.xlu0 %1171 }
 0xdfa   :  { %v1173_v43 = vsub.f32 %v1164_v30, %v1172_v42 }
 0xdfc   :  { %v1174_v44 = vmul.f32 1.442695, %v1173_v43 }
 0xdfe   :  { %1828 = vpow2.f32 %v1174_v44 }
 0xe0b   :  { %v1829_v57 = vpop.eup %1828 }
 0xe0c   :  { %v1176_v46 = vsel %vm1169_vm0, %v1829_v57, 0.0 }
 0xe0d   :  { %1177 = vadd.xlane.f32.xlu1 %v1176_v46 }
 0xe96   :  { %v1178_v45 = vpop.xlane.xlu1 %1177 }
 0xe97   :  { %1830 = vrcp.f32 %v1178_v45 }
 0xea4   :  { %v1831_v48 = vpop.eup %1830 }
 0xea5   :  { %v1180_v49 = vmul.f32 %v1831_v48, %v1829_v57 }
 0xea7   :  { %1181 = vst.msk [vmem:[%s2509_s8] sm:$0xff] %vm1169_vm0, %v1180_v49 }

</bundles_post_ra>
